<compile_context>
chip_gen: v7x
topology: tpu7x:2x2x1
jax: 0.10.0
libtpu: 0.0.40
codegen_flags: <defaults>
</compile_context>

<pallas_src>
import functools

import jax
import jax.numpy as jnp
from jax import lax
from jax.experimental import pallas as pl
from jax.experimental.pallas import tpu as pltpu


def _fixed_point_kernel(x_ref, w_ref, z_ref, *, tol_sq, max_iter):
    """Whole (padded) problem resides in VMEM; fixed-point loop runs in-kernel."""
    x = x_ref[...].astype(jnp.float32)        # (Bp, Fp)
    w = w_ref[...]                            # (Fp, Fp), native layout for MXU

    # z @ W.T without materializing a transposed copy of W:
    # contract z's dim 1 with W's dim 1.
    dn = (((1,), (1,)), ((), ()))

    def cond(carry):
        i, _, err_sq = carry
        return jnp.logical_and(i < max_iter, err_sq >= tol_sq)

    def body(carry):
        i, z, _ = carry
        zw = lax.dot_general(z.astype(w.dtype), w, dn,
                             preferred_element_type=jnp.float32)
        z_next = jnp.tanh(zw + x)             # add/tanh kept in f32 (EUP)
        d = z - z_next
        err_sq = jnp.sum(d * d)               # ||z - z_next||_F^2 (XLU reduce)
        return i + 1, z_next, err_sq

    init = (jnp.int32(0),
            jnp.zeros_like(x),
            jnp.array(jnp.inf, dtype=jnp.float32))
    _, z, _ = lax.while_loop(cond, body, init)
    z_ref[...] = z.astype(z_ref.dtype)


def tanh_fixed_point(x, w, *, tol=1e-4, max_iter=50):
    """x: (batch, out_features), w: (out_features, out_features) (PyTorch layout)."""
    batch, feat = x.shape
    assert w.shape == (feat, feat)

    # Lane-dense (multiple of 128) feature dim, sublane-dense (multiple of 8)
    # batch dim.  Zero padding leaves the fixed-point iteration bit-exact.
    fp = ((feat + 127) // 128) * 128
    bp = ((batch + 7) // 8) * 8

    x_p = jnp.zeros((bp, fp), x.dtype).at[:batch, :feat].set(x)
    w_p = jnp.zeros((fp, fp), w.dtype).at[:feat, :feat].set(w)

    kernel = functools.partial(
        _fixed_point_kernel, tol_sq=float(tol) ** 2, max_iter=max_iter)

    out = pl.pallas_call(
        kernel,
        out_shape=jax.ShapeDtypeStruct((bp, fp), x.dtype),
        # No grid: each array is a single full-extent block resident in VMEM.
        in_specs=[
            pl.BlockSpec((bp, fp), lambda: (0, 0)),
            pl.BlockSpec((fp, fp), lambda: (0, 0)),
        ],
        out_specs=pl.BlockSpec((bp, fp), lambda: (0, 0)),
        compiler_params=pltpu.CompilerParams(vmem_limit_bytes=64 << 20),
    )(x_p, w_p)

    return out[:batch, :feat]


def _reference(x, w, tol=1e-4, max_iter=50):
    """Pure-JAX reference mirroring the PyTorch loop (for correctness check)."""
    z = jnp.zeros_like(x)
    for _ in range(max_iter):
        z_next = jnp.tanh(z @ w.T + x)
        err = jnp.sqrt(jnp.sum((z - z_next) ** 2))
        z = z_next
        if float(err) < tol:
            break
    return z


if __name__ == "__main__":
    key = jax.random.PRNGKey(0)
    k_w, k_x = jax.random.split(key)

    batch, out_features = 8, 32

    # Deterministic nn.Linear-style init: U(-1/sqrt(F), 1/sqrt(F)), no bias.
    bound = 1.0 / (out_features ** 0.5)
    w = jax.random.uniform(
        k_w, (out_features, out_features), jnp.float32,
        minval=-bound, maxval=bound)
    x = jax.random.normal(k_x, (batch, out_features), jnp.float32)

    z = tanh_fixed_point(x, w, tol=1e-4, max_iter=50)
    jax.block_until_ready(z)

    z_ref = _reference(x, w, tol=1e-4, max_iter=50)
    assert z.shape == x.shape and z.dtype == x.dtype
    assert jnp.allclose(z, z_ref, atol=1e-5, rtol=1e-5), "mismatch vs reference"

    print("KERNEL_OK")
</pallas_src>

<mosaic_0001>
module attributes {stable_mosaic.version = 11 : i64} {
  func.func @_fixed_point_kernel(%arg0: memref<8x128xf32, #tpu.memory_space<vmem>>, %arg1: memref<128x128xf32, #tpu.memory_space<vmem>>, %arg2: memref<8x128xf32, #tpu.memory_space<vmem>>) attributes {dimension_semantics = [], scalar_prefetch = 0 : i64, scratch_operands = 0 : i64, tpu.core_type = #tpu.core_type<tc>} {
    %c0 = arith.constant 0 : index
    %c0_0 = arith.constant 0 : index
    %0 = vector.load %arg0[%c0, %c0_0] : memref<8x128xf32, #tpu.memory_space<vmem>>, vector<8x128xf32>
    %c0_1 = arith.constant 0 : index
    %c0_2 = arith.constant 0 : index
    %1 = vector.load %arg1[%c0_1, %c0_2] : memref<128x128xf32, #tpu.memory_space<vmem>>, vector<128x128xf32>
    %cst = arith.constant 0.000000e+00 : f32
    %2 = vector.broadcast %cst : f32 to vector<8x128xf32>
    %c0_i32 = arith.constant 0 : i32
    %cst_3 = arith.constant 0x7F800000 : f32
    %3:3 = scf.while (%arg3 = %c0_i32, %arg4 = %2, %arg5 = %cst_3) : (i32, vector<8x128xf32>, f32) -> (i32, vector<8x128xf32>, f32) {
      %c50_i32 = arith.constant 50 : i32
      %5 = arith.cmpi slt, %arg3, %c50_i32 : i32
      %cst_6 = arith.constant 9.99999993E-9 : f32
      %6 = arith.cmpf oge, %arg5, %cst_6 : f32
      %7 = arith.andi %5, %6 : i1
      scf.condition(%7) %arg3, %arg4, %arg5 : i32, vector<8x128xf32>, f32
    } do {
    ^bb0(%arg3: i32, %arg4: vector<8x128xf32>, %arg5: f32):
      %cst_6 = arith.constant dense<0.000000e+00> : vector<8x128xf32>
      %5 = tpu.matmul %arg4, %1, %cst_6 {dimension_numbers = #tpu.dot_dimension_numbers<[1], [1], [0], [0], [0, 0, 1, 0], [], []>} : vector<8x128xf32>, vector<128x128xf32>, vector<8x128xf32> -> vector<8x128xf32>
      %6 = arith.addf %5, %0 : vector<8x128xf32>
      %7 = math.tanh %6 : vector<8x128xf32>
      %8 = arith.subf %arg4, %7 : vector<8x128xf32>
      %9 = arith.mulf %8, %8 : vector<8x128xf32>
      %10 = vector.shape_cast %9 : vector<8x128xf32> to vector<1x8x128xf32>
      %cst_7 = arith.constant dense<0.000000e+00> : vector<1xf32>
      %11 = vector.multi_reduction <add>, %10, %cst_7 [1, 2] : vector<1x8x128xf32> to vector<1xf32>
      %12 = vector.shape_cast %11 : vector<1xf32> to vector<1x1x1xf32>
      %13 = vector.extract %12[0, 0, 0] : f32 from vector<1x1x1xf32>
      %c1_i32 = arith.constant 1 : i32
      %14 = arith.addi %arg3, %c1_i32 : i32
      scf.yield %14, %7, %13 : i32, vector<8x128xf32>, f32
    }
    %c0_4 = arith.constant 0 : index
    %c0_5 = arith.constant 0 : index
    %4 = vector.load %arg2[%c0_4, %c0_5] : memref<8x128xf32, #tpu.memory_space<vmem>>, vector<8x128xf32>
    tpu.vector_store %arg2[%c0_4, %c0_5], %3#1 {strides = array<i32>} : memref<8x128xf32, #tpu.memory_space<vmem>>, vector<8x128xf32>,
    return
  }
}

</mosaic_0001>

<bundles_post_ra>
// kernel: tpu_custom_call.1
= control target key start
LH: loop header
LB: loop body
LE: loop exit
PB: predicated region body
PF: predicated region fallthrough
CT: control target
= control target key end

     0   :  { %7 = vsyncpa [#allocation3], 0  ;;  %s484_s0 = inlined_call_operand.hbm [shape: f32[8,128], index: 0, kind: input, shape index: {}]   ;;  %s485_s1 = inlined_call_operand.hbm [shape: f32[128,128], index: 1, kind: input, shape index: {}]   ;;  %s486_s2 = inlined_call_operand.hbm [shape: f32[8,128], index: 2, kind: output, shape index: {}]  }
   0x1   :  { %8 = vsyncpa [#allocation6], 0 }
   0x2   :  { %9 = vsyncpa [#allocation4], 0  ;;  %s368_s9 = smov [#allocation2]   ;;  %s369_s11 = smov [#allocation5]  }
   0x3   :  { %s16_s10 = sshll.u32 %s368_s9, 4  ;;  %s25_s12 = sshll.u32 %s369_s11, 4  ;;  %s17_s10 = int_to_ptr.vmem [resolvable:$true] %s16_s10  ;;  %s391_s12 = int_to_ptr.vmem [resolvable:$true] %s25_s12 }
   0x4   :  { %s280_s15 = scalar_lea.hbm %s484_s0, 128 }
   0x5   :  { %p281_p0 = scmp.ne.s32.totalorder %s484_s0, %s280_s15  ;;  %p284_p1 = scmp.lt.u32.totalorder %s280_s15, %s484_s0 }
   0x7   :  { %p286_p2 = pnand %p284_p1, %p281_p0 }
   0x9   :  { %289 = shalt.err (!%p286_p2)
}
   0xa   :  { %s290_s20 = scalar_lea.vmem %s17_s10, 128  ;;  %p295_p4 = scmp.lt.s32.totalorder %s17_s10, %s17_s10 }
   0xb   :  { %p291_p3 = scmp.ne.s32.totalorder %s17_s10, %s290_s20  ;;  %p296_p5 = scmp.lt.s32.totalorder %s290_s20, %s290_s20 }
   0xd   :  { %p297_p6 = por %p296_p5, %p295_p4 }
   0xf   :  { %p298_p7 = pnand %p297_p6, %p291_p3 }
  0x11   :  { %301 = shalt.err (!%p298_p7)
}
  0x12   :  { %19 = dma.hbm_to_vmem [thread:$0]  %s484_s0, 128, %s17_s10, [#allocation3]  }
  0x13   :  { %s302_s25 = scalar_lea.hbm %s485_s1, 2048 }
  0x14   :  { %p303_p8 = scmp.ne.s32.totalorder %s485_s1, %s302_s25  ;;  %p306_p9 = scmp.lt.u32.totalorder %s302_s25, %s485_s1 }
  0x16   :  { %p308_p10 = pnand %p306_p9, %p303_p8 }
  0x18   :  { %311 = shalt.err (!%p308_p10)
}
  0x19   :  { %s312_s30 = scalar_lea.vmem %s391_s12, 2048  ;;  %p317_p12 = scmp.lt.s32.totalorder %s391_s12, %s391_s12 }
  0x1a   :  { %p313_p11 = scmp.ne.s32.totalorder %s391_s12, %s312_s30  ;;  %p318_p13 = scmp.lt.s32.totalorder %s312_s30, %s312_s30 }
  0x1c   :  { %p319_p0 = por %p318_p13, %p317_p12 }
  0x1e   :  { %p320_p1 = pnand %p319_p0, %p313_p11 }
  0x20   :  { %323 = shalt.err (!%p320_p1)
}
  0x21   :  { %s370_s0 = smov 128   ;;  %s371_s3 = smov 8  }
  0x22   :  { %31 = dma.hbm_to_vmem [thread:$0]  %s485_s1, 2048, %s391_s12, [#allocation6], %s370_s0, %s370_s0, %s371_s3  }
  0x23   :  { %354 = dma.done.wait [#allocation3], 128  }
  0x24   :  { %355 = vsyncadd [#allocation3], 4294967168 }
  0x25   :  { %356 = dma.done.wait [#allocation6], 2048  }
  0x26   :  { %357 = vsyncadd [#allocation6], 4294965248  ;;  %v422_v0 = vld [vmem:[#allocation2] sm:$0xff]  ;;  %v424_v1 = vld [vmem:[#allocation5] sm:$0xff]  ;;  %v360_v17 = vmov 0.0   ;;  %s450_s1 = smov 0  }
  0x27   :  { %v426_v2 = vld [vmem:[#allocation5 + $0x8] sm:$0xff]  ;;  %v428_v3 = vld [vmem:[#allocation5 + $0x10] sm:$0xff]  ;;  %v430_v4 = vld [vmem:[#allocation5 + $0x18] sm:$0xff] }
  0x28   :  { %v432_v5 = vld [vmem:[#allocation5 + $0x20] sm:$0xff]  ;;  %v434_v6 = vld [vmem:[#allocation5 + $0x28] sm:$0xff]  ;;  %v436_v7 = vld [vmem:[#allocation5 + $0x30] sm:$0xff] }
  0x29   :  { %v438_v8 = vld [vmem:[#allocation5 + $0x38] sm:$0xff]  ;;  %v440_v9 = vld [vmem:[#allocation5 + $0x40] sm:$0xff]  ;;  %v442_v10 = vld [vmem:[#allocation5 + $0x48] sm:$0xff] }
  0x2a   :  { %v444_v11 = vld [vmem:[#allocation5 + $0x50] sm:$0xff]  ;;  %v446_v12 = vld [vmem:[#allocation5 + $0x58] sm:$0xff]  ;;  %v448_v13 = vld [vmem:[#allocation5 + $0x60] sm:$0xff] }
  0x2b   :  { %v52_v14 = vld [vmem:[#allocation5 + $0x68] sm:$0xff]  ;;  %v53_v15 = vld [vmem:[#allocation5 + $0x70] sm:$0xff]  ;;  %v54_v16 = vld [vmem:[#allocation5 + $0x78] sm:$0xff] }
  0x2c LB: > { %v229_v18 = vpack.c.bf16 %v426_v2, %v424_v1  ;;  %v372_v19 = vmov 0.0|0.0   ;;  %vm373_vm0 = vmmov 0   ;;  %v374_v20 = vmov 0.0   ;;  %s147_s1 = sadd.s32 1, %s366_s1   ;;  %s366_s1 = sphi %s450_s1, %s147_s1   ;;  %v362_v17 = vphi %v360_v17, %v361_v17  }
  0x2d   : > { %228 = vmatprep.subr.bf16.mxu0 %v372_v19  ;;  %225 = vmatprep.mubr.msk.f32.mxu0 %vm373_vm0, %v374_v20  ;;  %v232_v21 = vpack.c.bf16 %v430_v4, %v428_v3  ;;  %v235_v22 = vpack.c.bf16 %v434_v6, %v432_v5  ;;  %v238_v23 = vpack.c.bf16 %v438_v8, %v436_v7  ;;  %p59_p2 = scmp.lt.s32.totalorder %s147_s1, 50 }
  0x2e   : > { %230 = vmatpush3.bf16.xpose.msra.mxu0 %v229_v18  ;;  %v241_v24 = vpack.c.bf16 %v442_v10, %v440_v9  ;;  %v244_v25 = vpack.c.bf16 %v446_v12, %v444_v11  ;;  %v247_v26 = vpack.c.bf16 %v52_v14, %v448_v13  ;;  %v250_v27 = vpack.c.bf16 %v54_v16, %v53_v15 }
  0x2f   : > { %231 = vmatprep.subr.bf16.mxu0 %v372_v19 }
  0x36   : > { %233 = vmatpush3.bf16.xpose.msra.mxu0 %v232_v21 }
  0x37   : > { %234 = vmatprep.subr.bf16.mxu0 %v372_v19 }
  0x3e   : > { %236 = vmatpush3.bf16.xpose.msra.mxu0 %v235_v22 }
  0x3f   : > { %237 = vmatprep.subr.bf16.mxu0 %v372_v19 }
  0x46   : > { %239 = vmatpush3.bf16.xpose.msra.mxu0 %v238_v23 }
  0x47   : > { %240 = vmatprep.subr.bf16.mxu0 %v372_v19 }
  0x4e   : > { %242 = vmatpush3.bf16.xpose.msra.mxu0 %v241_v24 }
  0x4f   : > { %243 = vmatprep.subr.bf16.mxu0 %v372_v19 }
  0x56   : > { %245 = vmatpush3.bf16.xpose.msra.mxu0 %v244_v25 }
  0x57   : > { %246 = vmatprep.subr.bf16.mxu0 %v372_v19 }
  0x5e   : > { %248 = vmatpush3.bf16.xpose.msra.mxu0 %v247_v26 }
  0x5f   : > { %249 = vmatprep.subr.bf16.mxu0 %v372_v19 }
  0x66   : > { %251 = vmatpush3.bf16.xpose.msra.mxu0 %v250_v27 }
  0x6d   : > { %226 = vmatmul.mubr.f32.vlgmr.msra.gmra.mrb[0].mxu0 %v362_v17 }
 0x140   : > { %v131_v28 = vpop.f32.mrb[0].mxu0 }
 0x141   : > { %v132_v29 = vadd.f32 %v131_v28, %v422_v0  ;;  %v227_v30 = vpop.f32.mrb[1].mxu0 }
 0x143   : > { %278 = vtanh.f32 %v132_v29 }
 0x14d   : > { %v279_v31 = vpop.eup %278  }
 0x14e   : > { %v136_v32 = vsub.f32 %v362_v17, %v279_v31  ;;  %v361_v17 = vmov %v279_v31  }
 0x150   : > { %v137_v33 = vmul.f32 %v136_v32, %v136_v32 }
 0x152   : > { %138 = vadd.xlane.f32.xlu0 %v137_v33 }
 0x1df   : > { %v139_v34 = vpop.xlane.xlu0 %138 }
 0x1e0   : > { %v140_v35 = vrot.slane %v139_v34, 4 }
 0x1e2   : > { %v141_v36 = vadd.f32 %v140_v35, %v139_v34 }
 0x1e4   : > { %v142_v37 = vrot.slane %v141_v36, 2 }
 0x1e6   : > { %v143_v38 = vadd.f32 %v142_v37, %v141_v36 }
 0x1e8   : > { %v144_v39 = vrot.slane %v143_v38, 1 }
 0x1ea   : > { %v145_v40 = vadd.f32 %v144_v39, %v143_v38 }
 0x1ec   : > { %252 = vpush %v145_v40 }
 0x21d   : > { %s253_s6 = spop %252 }
 0x21e   : > { %p60_p3 = scmp.ge.f32.partialorder %s253_s6, 1e-08 }
 0x220   : > { %p61_p4 = pnand %p60_p3, %p59_p2 }
 0x221   :  { %148 = vst [vmem:[#allocation7] sm:$0xff] (%p61_p4), %v279_v31  ;;  %s375_s7 = smov (%p61_p4), [#allocation7]  }
 0x222   :  { %64 = sbr.rel (!%p61_p4) target bundleno = 44 (0x2c), region = 43  ;;  %s155_s8 = sshll.u32 (%p61_p4), %s375_s7, 4  ;;  %s156_s8 = int_to_ptr.vmem [resolvable:$true] %s155_s8 }
 0x223   :  { %s324_s9 = scalar_lea.vmem (%p61_p4), %s156_s8, 128  ;;  %p329_p6 = scmp.lt.s32.totalorder (%p61_p4), %s156_s8, %s156_s8 }
 0x224   :  { %p325_p5 = scmp.ne.s32.totalorder (%p61_p4), %s156_s8, %s324_s9  ;;  %p330_p7 = scmp.lt.s32.totalorder (%p61_p4), %s324_s9, %s324_s9 }
 0x226   :  { %p331_p8 = por (%p61_p4), %p330_p7, %p329_p6 }
 0x228   :  { %p332_p9 = pnand (%p61_p4), %p331_p8, %p325_p5 }
 0x22a   :  { %335 = shalt.err (!%p332_p9)
}
 0x22b   :  { %s336_s12 = scalar_lea.hbm %s486_s2, 128 }
 0x22c   :  { %p337_p10 = scmp.ne.s32.totalorder %s486_s2, %s336_s12  ;;  %p340_p11 = scmp.lt.u32.totalorder %s336_s12, %s486_s2 }
 0x22e   :  { %p342_p12 = pnand %p340_p11, %p337_p10 }
 0x230   :  { %345 = shalt.err (!%p342_p12)
}
 0x231   :  { %158 = dma.vmem_to_hbm [thread:$0]  %s156_s8, 128, %s486_s2, [#allocation4]  }
 0x232   :  { %358 = dma.done.wait [#allocation4], 128  }
 0x233   :  { %359 = vsyncadd [#allocation4], 4294967168 }
 0x234   :  { %162 = vsyncpa [#allocation3], 1 }
 0x235   :  { %163 = vsyncpa [#allocation6], 1 }
 0x236   :  { %164 = vsyncpa [#allocation4], 1 }

</bundles_post_ra>
